<compile_context>
chip_gen: v7x
topology: tpu7x:2x2x1
jax: 0.10.0
libtpu: 0.0.40
codegen_flags: <defaults>
</compile_context>

<pallas_src>
import functools

import jax
import jax.numpy as jnp
from jax.experimental import pallas as pl
from jax.experimental.pallas import tpu as pltpu

# ----------------------------- config ---------------------------------------
B = 8          # batch (number of indices / thetas)
T = 4          # number of design steps
H = 32         # design-net hidden width (logical)
HP = 128       # hidden width padded to the 128-lane vreg width inside the kernel
G = 128        # time-grid length of the pre-simulated SDE trajectories
N = 64         # number of pre-simulated prior samples
LOWER = 0.01
UPPER = 100.0 - 0.01

# Packed weight-slab row layout (all blocks 8-sublane aligned):
#   rows 0:8    misc rows:  0 w_enc1[0]  1 w_enc1[1]  2 b_enc1  3 b_enc2
#                           4 b_em1      5 w_em2^T    6 b_em2   7 empty (unused in-kernel)
#   rows 8:136    w_enc2  (H,H) zero-padded to (HP,HP)
#   rows 136:264  w_em1   (H,H) zero-padded to (HP,HP)
SLAB_ROWS = 8 + 2 * HP


def _rollout_kernel(step0_ref, ys_ref, slab_ref, out_ref,
                    *, num_steps, inv_dt, lower, upper):
    ys = ys_ref[...]                                   # [B, G] f32
    b, g = ys.shape

    # --- hoisted parameter views (tile-aligned static slices; loaded once) ---
    misc = slab_ref[0:8, :]                            # [8, HP]
    w_enc2 = slab_ref[8:8 + HP, :]                     # [HP, HP]
    w_em1 = slab_ref[8 + HP:8 + 2 * HP, :]             # [HP, HP]

    wenc1_x = misc[0:1, :]                             # [1, HP]  (weight for xi_untransformed)
    wenc1_y = misc[1:2, :]                             # [1, HP]  (weight for observation y)
    benc1 = misc[2:3, :]                               # [1, HP]
    benc2 = misc[3:4, :]                               # [1, HP]
    bem1 = misc[4:5, :]                                # [1, HP]
    wem2 = misc[5:6, :]                                # [1, HP]  (emitter output weights, as a row)
    bem2 = misc[6:7, 0:1]                              # [1, 1]

    lane_g = jax.lax.broadcasted_iota(jnp.int32, (b, g), 1)
    lane_o = jax.lax.broadcasted_iota(jnp.int32, (b, 128), 1)

    def lookup(xi):
        # nearest-grid-time lookup into the pre-simulated trajectory (one-hot mask + reduce)
        idx = jnp.clip(jnp.round(xi * inv_dt), 0.0, float(g - 1)).astype(jnp.int32)  # [B,1]
        return jnp.sum(jnp.where(lane_g == idx, ys, 0.0), axis=-1, keepdims=True)    # [B,1]

    def encode(xi_un, y):
        # encoder of one (design, observation) pair; padded lanes stay exactly zero
        e1 = jnp.maximum(xi_un * wenc1_x + y * wenc1_y + benc1, 0.0)                 # [B,HP]
        return jnp.dot(e1, w_enc2, preferred_element_type=jnp.float32) + benc2       # [B,HP]

    def record(out, t, xi_un, xi, y):
        out = jnp.where(lane_o == t, xi_un, out)
        out = jnp.where(lane_o == num_steps + t, xi, out)
        out = jnp.where(lane_o == 2 * num_steps + t, y, out)
        return out

    out = jnp.zeros((b, 128), jnp.float32)

    # --- step 0: emitter output is batch-independent (constant-folded in the wrapper) ---
    xi_un = jnp.full((b, 1), step0_ref[0], jnp.float32)
    xi = jnp.full((b, 1), step0_ref[1], jnp.float32)
    y = lookup(xi)
    out = record(out, 0, xi_un, xi, y)
    if num_steps > 1:
        enc_sum = encode(xi_un, y)                     # history pooling (sum over pairs)

    # --- steps 1..T-1 (T is small & static: unrolled Python loop) ---
    for t in range(1, num_steps):
        # emitter MLP on pooled history
        h1 = jnp.maximum(
            jnp.dot(enc_sum, w_em1, preferred_element_type=jnp.float32) + bem1, 0.0)  # [B,HP]
        # narrow [HP,1] matmul replaced by VPU multiply + lane reduce (off the MXU)
        xi_un = jnp.sum(h1 * wem2, axis=-1, keepdims=True) + bem2                     # [B,1]
        # 'iid' design transform
        xi = lower + jax.nn.sigmoid(xi_un) * (upper - lower)                          # [B,1]
        # simulator lookup
        y = lookup(xi)                                                                # [B,1]
        out = record(out, t, xi_un, xi, y)
        if t < num_steps - 1:                           # final encoder update is dead work
            enc_sum = enc_sum + encode(xi_un, y)

    out_ref[...] = out                                  # single lane-dense (B,128) store


# ----------------------------- wrapper ---------------------------------------
def pack_design_net_params(params, lower=LOWER, upper=UPPER):
    """One-time packing: 9 arrays -> one lane-padded f32 slab + constant-folded step-0 scalars."""
    h = params["w_enc2"].shape[0]
    assert h <= HP

    def pad_row(v):                                     # (1, h) -> (1, HP)
        return jnp.pad(v.astype(jnp.float32), ((0, 0), (0, HP - v.shape[1])))

    def pad_mat(m):                                     # (h, h) -> (HP, HP)
        return jnp.pad(m.astype(jnp.float32), ((0, HP - h), (0, HP - h)))

    misc = jnp.concatenate([
        pad_row(params["w_enc1"][0:1, :]),
        pad_row(params["w_enc1"][1:2, :]),
        pad_row(params["b_enc1"]),
        pad_row(params["b_enc2"]),
        pad_row(params["b_em1"]),
        pad_row(params["w_em2"].T),
        pad_row(params["b_em2"]),
        pad_row(params["empty"]),
    ], axis=0)                                          # (8, HP)
    slab = jnp.concatenate([misc, pad_mat(params["w_enc2"]), pad_mat(params["w_em1"])], axis=0)
    assert slab.shape == (SLAB_ROWS, HP)

    # Constant-fold design step t=0: empty history -> pooled == `empty` (batch-independent).
    h0 = jnp.maximum(params["empty"] @ params["w_em1"] + params["b_em1"], 0.0)        # (1, h)
    xi_un0 = (h0 @ params["w_em2"] + params["b_em2"]).reshape(())
    xi0 = lower + jax.nn.sigmoid(xi_un0) * (upper - lower)
    step0 = jnp.stack([xi_un0, xi0]).astype(jnp.float32)                              # (2,)

    return {"slab": slab, "step0": step0}


def epidemic_var_forward(indices, simdata, packed, num_steps=T):
    """Pallas-backed equivalent of EpidemicVar.forward(indices)."""
    assert 3 * num_steps <= 128
    # Glue: row-major gather of per-index trajectories (ys stored [N, G]) and prior samples.
    ys_batch = simdata["ys"][indices].astype(jnp.float32)             # [B, G]
    theta = simdata["prior_samples"][indices, :]                      # [B, 2]  (= log().exp())
    dt = float(simdata["dt"])
    batch = ys_batch.shape[0]

    kernel = functools.partial(_rollout_kernel, num_steps=num_steps,
                               inv_dt=1.0 / dt, lower=LOWER, upper=UPPER)

    out = pl.pallas_call(
        kernel,
        out_shape=jax.ShapeDtypeStruct((batch, 128), jnp.float32),
        in_specs=[pl.BlockSpec(memory_space=pltpu.MemorySpace.SMEM),   # step-0 scalars
                  pl.BlockSpec(memory_space=pltpu.MemorySpace.VMEM),   # ys  [B, G]
                  pl.BlockSpec(memory_space=pltpu.MemorySpace.VMEM)],  # packed weight slab
        out_specs=pl.BlockSpec(memory_space=pltpu.MemorySpace.VMEM),
    )(packed["step0"], ys_batch, packed["slab"])

    xi_un = out[:, :num_steps]                                        # untransformed designs
    xi = out[:, num_steps:2 * num_steps]                              # transformed designs
    y = out[:, 2 * num_steps:3 * num_steps]                           # observations

    # Match the PyTorch return convention: lists over time of per-step tensors.
    designs = [xi_un[:, t:t + 1] for t in range(num_steps)]
    observations = [y[:, t:t + 1] for t in range(num_steps)]
    return theta, designs, observations, xi


# ---------------------- deterministic setup (glue) ---------------------------
def build_simdata(key):
    """Synthetic SIMDATA: prior samples + pre-simulated (deterministic-Euler) SIR curves.

    ys is stored [N, G] (row per prior sample) so the batch gather is row-major, and
    ys[:, k] corresponds to time k*dt (initial state prepended -> no off-by-one).
    """
    k_prior, = jax.random.split(key, 1)
    loc = jnp.log(jnp.array([0.5, 0.1], jnp.float32))
    log_theta = loc + 0.5 * jax.random.normal(k_prior, (N, 2), jnp.float32)
    prior_samples = jnp.exp(log_theta)                               # [N, 2] (beta, gamma)

    ts = jnp.linspace(0.0, 100.0, G)
    dt = float(ts[1] - ts[0])
    pop = 500.0
    beta = prior_samples[:, 0]
    gamma = prior_samples[:, 1]

    def step(carry, _):
        s, i = carry
        ds = -beta * s * i / pop
        di = beta * s * i / pop - gamma * i
        s = jnp.maximum(s + dt * ds, 0.0)
        i = jnp.maximum(i + dt * di, 0.0)
        return (s, i), i

    s0 = jnp.full((N,), pop - 2.0)
    i0 = jnp.full((N,), 2.0)
    _, inf_rest = jax.lax.scan(step, (s0, i0), None, length=G - 1)   # [G-1, N]
    infected = jnp.concatenate([i0[None, :], inf_rest], axis=0)      # [G, N], row k at time k*dt

    return {"ys": jnp.asarray(infected.T, jnp.float32),              # [N, G]
            "prior_samples": prior_samples,
            "ts": ts,
            "dt": dt,
            "num_samples": N}


def build_design_net_params(key):
    ks = jax.random.split(key, 5)
    return {
        "w_enc1": 0.05 * jax.random.normal(ks[0], (2, H), jnp.float32),
        "b_enc1": jnp.zeros((1, H), jnp.float32),
        "w_enc2": 0.30 * jax.random.normal(ks[1], (H, H), jnp.float32),
        "b_enc2": jnp.zeros((1, H), jnp.float32),
        "w_em1": 0.30 * jax.random.normal(ks[2], (H, H), jnp.float32),
        "b_em1": jnp.zeros((1, H), jnp.float32),
        "w_em2": 0.30 * jax.random.normal(ks[3], (H, 1), jnp.float32),
        "b_em2": jnp.zeros((1, 1), jnp.float32),
        "empty": 0.30 * jax.random.normal(ks[4], (1, H), jnp.float32),
    }


if __name__ == "__main__":
    key = jax.random.PRNGKey(0)
    k_sim, k_net, k_idx = jax.random.split(key, 3)

    simdata = build_simdata(k_sim)
    params = build_design_net_params(k_net)
    packed = pack_design_net_params(params)           # one-time pack + step-0 constant fold
    indices = jax.random.randint(k_idx, (B,), 0, N)

    theta, designs, observations, xi_transformed = epidemic_var_forward(
        indices, simdata, packed, num_steps=T)

    jax.block_until_ready((theta, designs, observations, xi_transformed))

    assert theta.shape == (B, 2)
    assert len(designs) == T and designs[0].shape == (B, 1)
    assert len(observations) == T and observations[0].shape == (B, 1)
    assert xi_transformed.shape == (B, T)
    assert bool(jnp.all(jnp.isfinite(xi_transformed)))
    assert bool(jnp.all((xi_transformed >= LOWER) & (xi_transformed <= UPPER)))

    print("KERNEL_OK")
</pallas_src>

<mosaic_0001>
module attributes {stable_mosaic.version = 11 : i64} {
  func.func @_rollout_kernel(%arg0: memref<2xf32, #tpu.memory_space<smem>>, %arg1: memref<8x128xf32, #tpu.memory_space<vmem>>, %arg2: memref<264x128xf32, #tpu.memory_space<vmem>>, %arg3: memref<8x128xf32, #tpu.memory_space<vmem>>) attributes {dimension_semantics = [], scalar_prefetch = 0 : i64, scratch_operands = 0 : i64, tpu.core_type = #tpu.core_type<tc>} {
    %c0 = arith.constant 0 : index
    %c0_0 = arith.constant 0 : index
    %0 = vector.load %arg1[%c0, %c0_0] : memref<8x128xf32, #tpu.memory_space<vmem>>, vector<8x128xf32>
    %c0_1 = arith.constant 0 : index
    %c0_2 = arith.constant 0 : index
    %1 = vector.load %arg2[%c0_1, %c0_2] : memref<264x128xf32, #tpu.memory_space<vmem>>, vector<8x128xf32>
    %c8 = arith.constant 8 : index
    %c0_3 = arith.constant 0 : index
    %2 = vector.load %arg2[%c8, %c0_3] : memref<264x128xf32, #tpu.memory_space<vmem>>, vector<128x128xf32>
    %c136 = arith.constant 136 : index
    %c0_4 = arith.constant 0 : index
    %3 = vector.load %arg2[%c136, %c0_4] : memref<264x128xf32, #tpu.memory_space<vmem>>, vector<128x128xf32>
    %4 = vector.extract_strided_slice %1 {offsets = [0, 0], sizes = [1, 128], strides = [1, 1]} : vector<8x128xf32> to vector<1x128xf32>
    %5 = vector.extract_strided_slice %1 {offsets = [1, 0], sizes = [1, 128], strides = [1, 1]} : vector<8x128xf32> to vector<1x128xf32>
    %6 = vector.extract_strided_slice %1 {offsets = [2, 0], sizes = [1, 128], strides = [1, 1]} : vector<8x128xf32> to vector<1x128xf32>
    %7 = vector.extract_strided_slice %1 {offsets = [3, 0], sizes = [1, 128], strides = [1, 1]} : vector<8x128xf32> to vector<1x128xf32>
    %8 = vector.extract_strided_slice %1 {offsets = [4, 0], sizes = [1, 128], strides = [1, 1]} : vector<8x128xf32> to vector<1x128xf32>
    %9 = vector.extract_strided_slice %1 {offsets = [5, 0], sizes = [1, 128], strides = [1, 1]} : vector<8x128xf32> to vector<1x128xf32>
    %10 = vector.extract_strided_slice %1 {offsets = [6, 0], sizes = [1, 1], strides = [1, 1]} : vector<8x128xf32> to vector<1x1xf32>
    %11 = tpu.iota {dimensions = array<i32: 1>} : vector<8x128xi32>
    %12 = tpu.iota {dimensions = array<i32: 1>} : vector<8x128xi32>
    %cst = arith.constant 0.000000e+00 : f32
    %13 = vector.broadcast %cst : f32 to vector<8x128xf32>
    %c0_5 = arith.constant 0 : index
    %14 = memref.load %arg0[%c0_5] : memref<2xf32, #tpu.memory_space<smem>>
    %15 = vector.broadcast %14 : f32 to vector<8x1xf32>
    %c1 = arith.constant 1 : index
    %16 = memref.load %arg0[%c1] : memref<2xf32, #tpu.memory_space<smem>>
    %17 = vector.broadcast %16 : f32 to vector<8x1xf32>
    %cst_6 = arith.constant 1.270000e+00 : f32
    %18 = vector.broadcast %cst_6 : f32 to vector<8x1xf32>
    %19 = arith.mulf %17, %18 : vector<8x1xf32>
    %20 = math.roundeven %19 : vector<8x1xf32>
    %cst_7 = arith.constant 0.000000e+00 : f32
    %cst_8 = arith.constant 1.270000e+02 : f32
    %21 = vector.broadcast %cst_7 : f32 to vector<8x1xf32>
    %22 = arith.maximumf %21, %20 : vector<8x1xf32>
    %23 = vector.broadcast %cst_8 : f32 to vector<8x1xf32>
    %24 = arith.minimumf %23, %22 : vector<8x1xf32>
    %25 = arith.fptosi %24 : vector<8x1xf32> to vector<8x1xi32>
    %26 = vector.broadcast %25 : vector<8x1xi32> to vector<8x128xi32>
    %27 = arith.cmpi eq, %11, %26 : vector<8x128xi32>
    %cst_9 = arith.constant 0.000000e+00 : f32
    %28 = vector.broadcast %cst_9 : f32 to vector<8x128xf32>
    %29 = arith.select %27, %0, %28 : vector<8x128xi1>, vector<8x128xf32>
    %cst_10 = arith.constant dense<0.000000e+00> : vector<8xf32>
    %30 = vector.multi_reduction <add>, %29, %cst_10 [1] : vector<8x128xf32> to vector<8xf32>
    %31 = vector.shape_cast %30 : vector<8xf32> to vector<8x1xf32>
    %c0_i32 = arith.constant 0 : i32
    %32 = vector.broadcast %c0_i32 : i32 to vector<8x128xi32>
    %33 = arith.cmpi eq, %12, %32 : vector<8x128xi32>
    %34 = vector.shape_cast %15 : vector<8x1xf32> to vector<8x1xf32>
    %35 = vector.broadcast %34 : vector<8x1xf32> to vector<8x128xf32>
    %36 = arith.select %33, %35, %13 : vector<8x128xi1>, vector<8x128xf32>
    %c4_i32 = arith.constant 4 : i32
    %37 = vector.broadcast %c4_i32 : i32 to vector<8x128xi32>
    %38 = arith.cmpi eq, %12, %37 : vector<8x128xi32>
    %39 = vector.shape_cast %17 : vector<8x1xf32> to vector<8x1xf32>
    %40 = vector.broadcast %39 : vector<8x1xf32> to vector<8x128xf32>
    %41 = arith.select %38, %40, %36 : vector<8x128xi1>, vector<8x128xf32>
    %c8_i32 = arith.constant 8 : i32
    %42 = vector.broadcast %c8_i32 : i32 to vector<8x128xi32>
    %43 = arith.cmpi eq, %12, %42 : vector<8x128xi32>
    %44 = vector.shape_cast %31 : vector<8x1xf32> to vector<8x1xf32>
    %45 = vector.broadcast %44 : vector<8x1xf32> to vector<8x128xf32>
    %46 = arith.select %43, %45, %41 : vector<8x128xi1>, vector<8x128xf32>
    %47 = vector.broadcast %15 : vector<8x1xf32> to vector<8x128xf32>
    %48 = vector.broadcast %4 : vector<1x128xf32> to vector<8x128xf32>
    %49 = arith.mulf %47, %48 : vector<8x128xf32>
    %50 = vector.broadcast %31 : vector<8x1xf32> to vector<8x128xf32>
    %51 = vector.broadcast %5 : vector<1x128xf32> to vector<8x128xf32>
    %52 = arith.mulf %50, %51 : vector<8x128xf32>
    %53 = arith.addf %49, %52 : vector<8x128xf32>
    %54 = vector.broadcast %6 : vector<1x128xf32> to vector<8x128xf32>
    %55 = arith.addf %53, %54 : vector<8x128xf32>
    %cst_11 = arith.constant 0.000000e+00 : f32
    %56 = vector.broadcast %cst_11 : f32 to vector<8x128xf32>
    %57 = arith.maximumf %55, %56 : vector<8x128xf32>
    %cst_12 = arith.constant dense<0.000000e+00> : vector<8x128xf32>
    %58 = tpu.matmul %57, %2, %cst_12 {dimension_numbers = #tpu.dot_dimension_numbers<[1], [0], [0], [1], [0, 0, 1, 1], [], []>} : vector<8x128xf32>, vector<128x128xf32>, vector<8x128xf32> -> vector<8x128xf32>
    %59 = vector.broadcast %7 : vector<1x128xf32> to vector<8x128xf32>
    %60 = arith.addf %58, %59 : vector<8x128xf32>
    %cst_13 = arith.constant dense<0.000000e+00> : vector<8x128xf32>
    %61 = tpu.matmul %60, %3, %cst_13 {dimension_numbers = #tpu.dot_dimension_numbers<[1], [0], [0], [1], [0, 0, 1, 1], [], []>} : vector<8x128xf32>, vector<128x128xf32>, vector<8x128xf32> -> vector<8x128xf32>
    %62 = vector.broadcast %8 : vector<1x128xf32> to vector<8x128xf32>
    %63 = arith.addf %61, %62 : vector<8x128xf32>
    %cst_14 = arith.constant 0.000000e+00 : f32
    %64 = vector.broadcast %cst_14 : f32 to vector<8x128xf32>
    %65 = arith.maximumf %63, %64 : vector<8x128xf32>
    %66 = vector.broadcast %9 : vector<1x128xf32> to vector<8x128xf32>
    %67 = arith.mulf %65, %66 : vector<8x128xf32>
    %cst_15 = arith.constant dense<0.000000e+00> : vector<8xf32>
    %68 = vector.multi_reduction <add>, %67, %cst_15 [1] : vector<8x128xf32> to vector<8xf32>
    %69 = vector.shape_cast %68 : vector<8xf32> to vector<8x1xf32>
    %70 = vector.broadcast %10 : vector<1x1xf32> to vector<8x1xf32>
    %71 = arith.addf %69, %70 : vector<8x1xf32>
    %72 = arith.negf %71 : vector<8x1xf32>
    %73 = math.exp %72 : vector<8x1xf32>
    %cst_16 = arith.constant 1.000000e+00 : f32
    %74 = vector.broadcast %cst_16 : f32 to vector<8x1xf32>
    %75 = arith.addf %74, %73 : vector<8x1xf32>
    %76 = arith.divf %74, %75 : vector<8x1xf32>
    %cst_17 = arith.constant 9.998000e+01 : f32
    %77 = vector.broadcast %cst_17 : f32 to vector<8x1xf32>
    %78 = arith.mulf %76, %77 : vector<8x1xf32>
    %cst_18 = arith.constant 0.00999999977 : f32
    %79 = vector.broadcast %cst_18 : f32 to vector<8x1xf32>
    %80 = arith.addf %79, %78 : vector<8x1xf32>
    %cst_19 = arith.constant 1.270000e+00 : f32
    %81 = vector.broadcast %cst_19 : f32 to vector<8x1xf32>
    %82 = arith.mulf %80, %81 : vector<8x1xf32>
    %83 = math.roundeven %82 : vector<8x1xf32>
    %cst_20 = arith.constant 0.000000e+00 : f32
    %cst_21 = arith.constant 1.270000e+02 : f32
    %84 = vector.broadcast %cst_20 : f32 to vector<8x1xf32>
    %85 = arith.maximumf %84, %83 : vector<8x1xf32>
    %86 = vector.broadcast %cst_21 : f32 to vector<8x1xf32>
    %87 = arith.minimumf %86, %85 : vector<8x1xf32>
    %88 = arith.fptosi %87 : vector<8x1xf32> to vector<8x1xi32>
    %89 = vector.broadcast %88 : vector<8x1xi32> to vector<8x128xi32>
    %90 = arith.cmpi eq, %11, %89 : vector<8x128xi32>
    %cst_22 = arith.constant 0.000000e+00 : f32
    %91 = vector.broadcast %cst_22 : f32 to vector<8x128xf32>
    %92 = arith.select %90, %0, %91 : vector<8x128xi1>, vector<8x128xf32>
    %cst_23 = arith.constant dense<0.000000e+00> : vector<8xf32>
    %93 = vector.multi_reduction <add>, %92, %cst_23 [1] : vector<8x128xf32> to vector<8xf32>
    %94 = vector.shape_cast %93 : vector<8xf32> to vector<8x1xf32>
    %c1_i32 = arith.constant 1 : i32
    %95 = vector.broadcast %c1_i32 : i32 to vector<8x128xi32>
    %96 = arith.cmpi eq, %12, %95 : vector<8x128xi32>
    %97 = vector.shape_cast %71 : vector<8x1xf32> to vector<8x1xf32>
    %98 = vector.broadcast %97 : vector<8x1xf32> to vector<8x128xf32>
    %99 = arith.select %96, %98, %46 : vector<8x128xi1>, vector<8x128xf32>
    %c5_i32 = arith.constant 5 : i32
    %100 = vector.broadcast %c5_i32 : i32 to vector<8x128xi32>
    %101 = arith.cmpi eq, %12, %100 : vector<8x128xi32>
    %102 = vector.shape_cast %80 : vector<8x1xf32> to vector<8x1xf32>
    %103 = vector.broadcast %102 : vector<8x1xf32> to vector<8x128xf32>
    %104 = arith.select %101, %103, %99 : vector<8x128xi1>, vector<8x128xf32>
    %c9_i32 = arith.constant 9 : i32
    %105 = vector.broadcast %c9_i32 : i32 to vector<8x128xi32>
    %106 = arith.cmpi eq, %12, %105 : vector<8x128xi32>
    %107 = vector.shape_cast %94 : vector<8x1xf32> to vector<8x1xf32>
    %108 = vector.broadcast %107 : vector<8x1xf32> to vector<8x128xf32>
    %109 = arith.select %106, %108, %104 : vector<8x128xi1>, vector<8x128xf32>
    %110 = vector.broadcast %71 : vector<8x1xf32> to vector<8x128xf32>
    %111 = vector.broadcast %4 : vector<1x128xf32> to vector<8x128xf32>
    %112 = arith.mulf %110, %111 : vector<8x128xf32>
    %113 = vector.broadcast %94 : vector<8x1xf32> to vector<8x128xf32>
    %114 = vector.broadcast %5 : vector<1x128xf32> to vector<8x128xf32>
    %115 = arith.mulf %113, %114 : vector<8x128xf32>
    %116 = arith.addf %112, %115 : vector<8x128xf32>
    %117 = vector.broadcast %6 : vector<1x128xf32> to vector<8x128xf32>
    %118 = arith.addf %116, %117 : vector<8x128xf32>
    %cst_24 = arith.constant 0.000000e+00 : f32
    %119 = vector.broadcast %cst_24 : f32 to vector<8x128xf32>
    %120 = arith.maximumf %118, %119 : vector<8x128xf32>
    %cst_25 = arith.constant dense<0.000000e+00> : vector<8x128xf32>
    %121 = tpu.matmul %120, %2, %cst_25 {dimension_numbers = #tpu.dot_dimension_numbers<[1], [0], [0], [1], [0, 0, 1, 1], [], []>} : vector<8x128xf32>, vector<128x128xf32>, vector<8x128xf32> -> vector<8x128xf32>
    %122 = vector.broadcast %7 : vector<1x128xf32> to vector<8x128xf32>
    %123 = arith.addf %121, %122 : vector<8x128xf32>
    %124 = arith.addf %60, %123 : vector<8x128xf32>
    %cst_26 = arith.constant dense<0.000000e+00> : vector<8x128xf32>
    %125 = tpu.matmul %124, %3, %cst_26 {dimension_numbers = #tpu.dot_dimension_numbers<[1], [0], [0], [1], [0, 0, 1, 1], [], []>} : vector<8x128xf32>, vector<128x128xf32>, vector<8x128xf32> -> vector<8x128xf32>
    %126 = vector.broadcast %8 : vector<1x128xf32> to vector<8x128xf32>
    %127 = arith.addf %125, %126 : vector<8x128xf32>
    %cst_27 = arith.constant 0.000000e+00 : f32
    %128 = vector.broadcast %cst_27 : f32 to vector<8x128xf32>
    %129 = arith.maximumf %127, %128 : vector<8x128xf32>
    %130 = vector.broadcast %9 : vector<1x128xf32> to vector<8x128xf32>
    %131 = arith.mulf %129, %130 : vector<8x128xf32>
    %cst_28 = arith.constant dense<0.000000e+00> : vector<8xf32>
    %132 = vector.multi_reduction <add>, %131, %cst_28 [1] : vector<8x128xf32> to vector<8xf32>
    %133 = vector.shape_cast %132 : vector<8xf32> to vector<8x1xf32>
    %134 = vector.broadcast %10 : vector<1x1xf32> to vector<8x1xf32>
    %135 = arith.addf %133, %134 : vector<8x1xf32>
    %136 = arith.negf %135 : vector<8x1xf32>
    %137 = math.exp %136 : vector<8x1xf32>
    %cst_29 = arith.constant 1.000000e+00 : f32
    %138 = vector.broadcast %cst_29 : f32 to vector<8x1xf32>
    %139 = arith.addf %138, %137 : vector<8x1xf32>
    %140 = arith.divf %138, %139 : vector<8x1xf32>
    %cst_30 = arith.constant 9.998000e+01 : f32
    %141 = vector.broadcast %cst_30 : f32 to vector<8x1xf32>
    %142 = arith.mulf %140, %141 : vector<8x1xf32>
    %cst_31 = arith.constant 0.00999999977 : f32
    %143 = vector.broadcast %cst_31 : f32 to vector<8x1xf32>
    %144 = arith.addf %143, %142 : vector<8x1xf32>
    %cst_32 = arith.constant 1.270000e+00 : f32
    %145 = vector.broadcast %cst_32 : f32 to vector<8x1xf32>
    %146 = arith.mulf %144, %145 : vector<8x1xf32>
    %147 = math.roundeven %146 : vector<8x1xf32>
    %cst_33 = arith.constant 0.000000e+00 : f32
    %cst_34 = arith.constant 1.270000e+02 : f32
    %148 = vector.broadcast %cst_33 : f32 to vector<8x1xf32>
    %149 = arith.maximumf %148, %147 : vector<8x1xf32>
    %150 = vector.broadcast %cst_34 : f32 to vector<8x1xf32>
    %151 = arith.minimumf %150, %149 : vector<8x1xf32>
    %152 = arith.fptosi %151 : vector<8x1xf32> to vector<8x1xi32>
    %153 = vector.broadcast %152 : vector<8x1xi32> to vector<8x128xi32>
    %154 = arith.cmpi eq, %11, %153 : vector<8x128xi32>
    %cst_35 = arith.constant 0.000000e+00 : f32
    %155 = vector.broadcast %cst_35 : f32 to vector<8x128xf32>
    %156 = arith.select %154, %0, %155 : vector<8x128xi1>, vector<8x128xf32>
    %cst_36 = arith.constant dense<0.000000e+00> : vector<8xf32>
    %157 = vector.multi_reduction <add>, %156, %cst_36 [1] : vector<8x128xf32> to vector<8xf32>
    %158 = vector.shape_cast %157 : vector<8xf32> to vector<8x1xf32>
    %c2_i32 = arith.constant 2 : i32
    %159 = vector.broadcast %c2_i32 : i32 to vector<8x128xi32>
    %160 = arith.cmpi eq, %12, %159 : vector<8x128xi32>
    %161 = vector.shape_cast %135 : vector<8x1xf32> to vector<8x1xf32>
    %162 = vector.broadcast %161 : vector<8x1xf32> to vector<8x128xf32>
    %163 = arith.select %160, %162, %109 : vector<8x128xi1>, vector<8x128xf32>
    %c6_i32 = arith.constant 6 : i32
    %164 = vector.broadcast %c6_i32 : i32 to vector<8x128xi32>
    %165 = arith.cmpi eq, %12, %164 : vector<8x128xi32>
    %166 = vector.shape_cast %144 : vector<8x1xf32> to vector<8x1xf32>
    %167 = vector.broadcast %166 : vector<8x1xf32> to vector<8x128xf32>
    %168 = arith.select %165, %167, %163 : vector<8x128xi1>, vector<8x128xf32>
    %c10_i32 = arith.constant 10 : i32
    %169 = vector.broadcast %c10_i32 : i32 to vector<8x128xi32>
    %170 = arith.cmpi eq, %12, %169 : vector<8x128xi32>
    %171 = vector.shape_cast %158 : vector<8x1xf32> to vector<8x1xf32>
    %172 = vector.broadcast %171 : vector<8x1xf32> to vector<8x128xf32>
    %173 = arith.select %170, %172, %168 : vector<8x128xi1>, vector<8x128xf32>
    %174 = vector.broadcast %135 : vector<8x1xf32> to vector<8x128xf32>
    %175 = vector.broadcast %4 : vector<1x128xf32> to vector<8x128xf32>
    %176 = arith.mulf %174, %175 : vector<8x128xf32>
    %177 = vector.broadcast %158 : vector<8x1xf32> to vector<8x128xf32>
    %178 = vector.broadcast %5 : vector<1x128xf32> to vector<8x128xf32>
    %179 = arith.mulf %177, %178 : vector<8x128xf32>
    %180 = arith.addf %176, %179 : vector<8x128xf32>
    %181 = vector.broadcast %6 : vector<1x128xf32> to vector<8x128xf32>
    %182 = arith.addf %180, %181 : vector<8x128xf32>
    %cst_37 = arith.constant 0.000000e+00 : f32
    %183 = vector.broadcast %cst_37 : f32 to vector<8x128xf32>
    %184 = arith.maximumf %182, %183 : vector<8x128xf32>
    %cst_38 = arith.constant dense<0.000000e+00> : vector<8x128xf32>
    %185 = tpu.matmul %184, %2, %cst_38 {dimension_numbers = #tpu.dot_dimension_numbers<[1], [0], [0], [1], [0, 0, 1, 1], [], []>} : vector<8x128xf32>, vector<128x128xf32>, vector<8x128xf32> -> vector<8x128xf32>
    %186 = vector.broadcast %7 : vector<1x128xf32> to vector<8x128xf32>
    %187 = arith.addf %185, %186 : vector<8x128xf32>
    %188 = arith.addf %124, %187 : vector<8x128xf32>
    %cst_39 = arith.constant dense<0.000000e+00> : vector<8x128xf32>
    %189 = tpu.matmul %188, %3, %cst_39 {dimension_numbers = #tpu.dot_dimension_numbers<[1], [0], [0], [1], [0, 0, 1, 1], [], []>} : vector<8x128xf32>, vector<128x128xf32>, vector<8x128xf32> -> vector<8x128xf32>
    %190 = vector.broadcast %8 : vector<1x128xf32> to vector<8x128xf32>
    %191 = arith.addf %189, %190 : vector<8x128xf32>
    %cst_40 = arith.constant 0.000000e+00 : f32
    %192 = vector.broadcast %cst_40 : f32 to vector<8x128xf32>
    %193 = arith.maximumf %191, %192 : vector<8x128xf32>
    %194 = vector.broadcast %9 : vector<1x128xf32> to vector<8x128xf32>
    %195 = arith.mulf %193, %194 : vector<8x128xf32>
    %cst_41 = arith.constant dense<0.000000e+00> : vector<8xf32>
    %196 = vector.multi_reduction <add>, %195, %cst_41 [1] : vector<8x128xf32> to vector<8xf32>
    %197 = vector.shape_cast %196 : vector<8xf32> to vector<8x1xf32>
    %198 = vector.broadcast %10 : vector<1x1xf32> to vector<8x1xf32>
    %199 = arith.addf %197, %198 : vector<8x1xf32>
    %200 = arith.negf %199 : vector<8x1xf32>
    %201 = math.exp %200 : vector<8x1xf32>
    %cst_42 = arith.constant 1.000000e+00 : f32
    %202 = vector.broadcast %cst_42 : f32 to vector<8x1xf32>
    %203 = arith.addf %202, %201 : vector<8x1xf32>
    %204 = arith.divf %202, %203 : vector<8x1xf32>
    %cst_43 = arith.constant 9.998000e+01 : f32
    %205 = vector.broadcast %cst_43 : f32 to vector<8x1xf32>
    %206 = arith.mulf %204, %205 : vector<8x1xf32>
    %cst_44 = arith.constant 0.00999999977 : f32
    %207 = vector.broadcast %cst_44 : f32 to vector<8x1xf32>
    %208 = arith.addf %207, %206 : vector<8x1xf32>
    %cst_45 = arith.constant 1.270000e+00 : f32
    %209 = vector.broadcast %cst_45 : f32 to vector<8x1xf32>
    %210 = arith.mulf %208, %209 : vector<8x1xf32>
    %211 = math.roundeven %210 : vector<8x1xf32>
    %cst_46 = arith.constant 0.000000e+00 : f32
    %cst_47 = arith.constant 1.270000e+02 : f32
    %212 = vector.broadcast %cst_46 : f32 to vector<8x1xf32>
    %213 = arith.maximumf %212, %211 : vector<8x1xf32>
    %214 = vector.broadcast %cst_47 : f32 to vector<8x1xf32>
    %215 = arith.minimumf %214, %213 : vector<8x1xf32>
    %216 = arith.fptosi %215 : vector<8x1xf32> to vector<8x1xi32>
    %217 = vector.broadcast %216 : vector<8x1xi32> to vector<8x128xi32>
    %218 = arith.cmpi eq, %11, %217 : vector<8x128xi32>
    %cst_48 = arith.constant 0.000000e+00 : f32
    %219 = vector.broadcast %cst_48 : f32 to vector<8x128xf32>
    %220 = arith.select %218, %0, %219 : vector<8x128xi1>, vector<8x128xf32>
    %cst_49 = arith.constant dense<0.000000e+00> : vector<8xf32>
    %221 = vector.multi_reduction <add>, %220, %cst_49 [1] : vector<8x128xf32> to vector<8xf32>
    %222 = vector.shape_cast %221 : vector<8xf32> to vector<8x1xf32>
    %c3_i32 = arith.constant 3 : i32
    %223 = vector.broadcast %c3_i32 : i32 to vector<8x128xi32>
    %224 = arith.cmpi eq, %12, %223 : vector<8x128xi32>
    %225 = vector.shape_cast %199 : vector<8x1xf32> to vector<8x1xf32>
    %226 = vector.broadcast %225 : vector<8x1xf32> to vector<8x128xf32>
    %227 = arith.select %224, %226, %173 : vector<8x128xi1>, vector<8x128xf32>
    %c7_i32 = arith.constant 7 : i32
    %228 = vector.broadcast %c7_i32 : i32 to vector<8x128xi32>
    %229 = arith.cmpi eq, %12, %228 : vector<8x128xi32>
    %230 = vector.shape_cast %208 : vector<8x1xf32> to vector<8x1xf32>
    %231 = vector.broadcast %230 : vector<8x1xf32> to vector<8x128xf32>
    %232 = arith.select %229, %231, %227 : vector<8x128xi1>, vector<8x128xf32>
    %c11_i32 = arith.constant 11 : i32
    %233 = vector.broadcast %c11_i32 : i32 to vector<8x128xi32>
    %234 = arith.cmpi eq, %12, %233 : vector<8x128xi32>
    %235 = vector.shape_cast %222 : vector<8x1xf32> to vector<8x1xf32>
    %236 = vector.broadcast %235 : vector<8x1xf32> to vector<8x128xf32>
    %237 = arith.select %234, %236, %232 : vector<8x128xi1>, vector<8x128xf32>
    %c0_50 = arith.constant 0 : index
    %c0_51 = arith.constant 0 : index
    %238 = vector.load %arg3[%c0_50, %c0_51] : memref<8x128xf32, #tpu.memory_space<vmem>>, vector<8x128xf32>
    tpu.vector_store %arg3[%c0_50, %c0_51], %237 {strides = array<i32>} : memref<8x128xf32, #tpu.memory_space<vmem>>, vector<8x128xf32>,
    return
  }
}

</mosaic_0001>

<bundles_post_ra>
// kernel: tpu_custom_call.1
= control target key start
LH: loop header
LB: loop body
LE: loop exit
PB: predicated region body
PF: predicated region fallthrough
CT: control target
= control target key end

     0   :  { %8 = vsyncpa [#allocation5], 0  ;;  %s1636_s0 = inlined_call_operand.hbm [shape: f32[2], index: 0, kind: input, shape index: {}]   ;;  %s1637_s1 = inlined_call_operand.hbm [shape: f32[8,128], index: 1, kind: input, shape index: {}]   ;;  %s1638_s2 = inlined_call_operand.hbm [shape: f32[264,128], index: 2, kind: input, shape index: {}]   ;;  %s1639_s3 = inlined_call_operand.hbm [shape: f32[8,128], index: 3, kind: output, shape index: {}]  }
   0x1   :  { %9 = vsyncpa [#allocation3], 0 }
   0x2   :  { %10 = vsyncpa [#allocation8], 0 }
   0x3   :  { %11 = vsyncpa [#allocation4], 0  ;;  %s1221_s14 = scalar_lea.hbm %s1636_s0, 16 }
   0x4   :  { %p1222_p0 = scmp.ne.s32.totalorder %s1636_s0, %s1221_s14  ;;  %p1225_p1 = scmp.lt.u32.totalorder %s1221_s14, %s1636_s0 }
   0x6   :  { %p1227_p2 = pnand %p1225_p1, %p1222_p0 }
   0x8   :  { %1230 = shalt.err (!%p1227_p2)
}
   0x9   :  { %s1305_s19 = smov [#allocation2]   ;;  %s1306_s22 = smov [#allocation6]  }
   0xa   :  { %19 = dma.hbm_to_smem %s1636_s0, 16, %s1305_s19, [#allocation5]  }
   0xb   :  { %s26_s23 = sshll.u32 %s1306_s22, 4  ;;  %s1307_s24 = smov [#allocation7]   ;;  %s27_s23 = int_to_ptr.vmem [resolvable:$true] %s26_s23 }
   0xc   :  { %s35_s25 = sshll.u32 %s1307_s24, 4  ;;  %s1231_s28 = scalar_lea.hbm %s1637_s1, 128  ;;  %s36_s25 = int_to_ptr.vmem [resolvable:$true] %s35_s25 }
   0xd   :  { %p1232_p3 = scmp.ne.s32.totalorder %s1637_s1, %s1231_s28  ;;  %p1235_p4 = scmp.lt.u32.totalorder %s1231_s28, %s1637_s1 }
   0xf   :  { %p1237_p5 = pnand %p1235_p4, %p1232_p3 }
  0x11   :  { %1240 = shalt.err (!%p1237_p5)
}
  0x12   :  { %s1241_s0 = scalar_lea.vmem %s27_s23, 128  ;;  %p1246_p7 = scmp.lt.s32.totalorder %s27_s23, %s27_s23 }
  0x13   :  { %p1242_p6 = scmp.ne.s32.totalorder %s27_s23, %s1241_s0  ;;  %p1247_p8 = scmp.lt.s32.totalorder %s1241_s0, %s1241_s0 }
  0x15   :  { %p1248_p9 = por %p1247_p8, %p1246_p7 }
  0x17   :  { %p1249_p10 = pnand %p1248_p9, %p1242_p6 }
  0x19   :  { %1252 = shalt.err (!%p1249_p10)
}
  0x1a   :  { %29 = dma.hbm_to_vmem [thread:$0]  %s1637_s1, 128, %s27_s23, [#allocation3]  }
  0x1b   :  { %s1253_s10 = scalar_lea.hbm %s1638_s2, 4224 }
  0x1c   :  { %p1254_p11 = scmp.ne.s32.totalorder %s1638_s2, %s1253_s10  ;;  %p1257_p12 = scmp.lt.u32.totalorder %s1253_s10, %s1638_s2 }
  0x1e   :  { %p1259_p13 = pnand %p1257_p12, %p1254_p11 }
  0x20   :  { %1262 = shalt.err (!%p1259_p13)
}
  0x21   :  { %s1263_s15 = scalar_lea.vmem %s36_s25, 4224  ;;  %p1268_p1 = scmp.lt.s32.totalorder %s36_s25, %s36_s25 }
  0x22   :  { %p1264_p0 = scmp.ne.s32.totalorder %s36_s25, %s1263_s15  ;;  %p1269_p2 = scmp.lt.s32.totalorder %s1263_s15, %s1263_s15 }
  0x24   :  { %p1270_p3 = por %p1269_p2, %p1268_p1 }
  0x26   :  { %p1271_p4 = pnand %p1270_p3, %p1264_p0 }
  0x28   :  { %1274 = shalt.err (!%p1271_p4)
}
  0x29   :  { %s1308_s1 = smov 128   ;;  %s1309_s16 = smov 8  }
  0x2a   :  { %41 = dma.hbm_to_vmem [thread:$0]  %s1638_s2, 4224, %s36_s25, [#allocation8], %s1308_s1, %s1308_s1, %s1309_s16  }
  0x2b   :  { %1297 = dma.done.wait [#allocation5], 16  }
  0x2c   :  { %1298 = vsyncadd [#allocation5], 4294967280 }
  0x2d   :  { %1299 = dma.done.wait [#allocation3], 128  }
  0x2e   :  { %1300 = vsyncadd [#allocation3], 4294967168 }
  0x2f   :  { %1301 = dma.done.wait [#allocation8], 4224  }
  0x30   :  { %1302 = vsyncadd [#allocation8], 4294963072 }
  0x31   :  { %51 = sfence }
  0x32   :  { %v86_v0 = vlaneseq  ;;  %s713_s19 = sld [smem:[#allocation2 + $0x1]]  ;;  %v54_v1 = vld [vmem:[#allocation7 + $0x8] sm:$0xff]  ;;  %v55_v2 = vld [vmem:[#allocation7 + $0x10] sm:$0xff]  ;;  %v1310_v3 = vmov 0.0|0.0   ;;  %v56_v5 = vld [vmem:[#allocation7 + $0x18] sm:$0xff]  ;;  %s1374_s20 = sld [smem:[#allocation2]] }
  0x33   :  { %1041 = vmatprep.subr.bf16.mxu0 %v1310_v3  ;;  %v1372_v4 = vpack.c.bf16 %v55_v2, %v54_v1  ;;  %v57_v6 = vld [vmem:[#allocation7 + $0x20] sm:$0xff]  ;;  %1065 = vmatprep.subr.bf16.mxu1 %v1310_v3  ;;  %v58_v9 = vld [vmem:[#allocation7 + $0x28] sm:$0xff]  ;;  %v59_v10 = vld [vmem:[#allocation7 + $0x30] sm:$0xff]  ;;  %vm1311_vm3 = vmmov 0   ;;  %v1312_v37 = vmov 0.0   ;;  %s1314_s2 = smov [#allocation9]  }
  0x34   :  { %v1378_v7 = vand.u32 127, %v86_v0  ;;  %v1381_v8 = vpack.c.bf16 %v57_v6, %v56_v5  ;;  %v1387_v13 = vpack.c.bf16 %v59_v10, %v58_v9  ;;  %v60_v15 = vld [vmem:[#allocation7 + $0x38] sm:$0xff]  ;;  %v61_v16 = vld [vmem:[#allocation7 + $0x40] sm:$0xff]  ;;  %v62_v22 = vld [vmem:[#allocation7 + $0x48] sm:$0xff]  ;;  %863 = vmatprep.mubr.msk.f32.mxu0 %vm1311_vm3, %v1312_v37  ;;  %898 = vmatprep.mubr.msk.f32.mxu1 %vm1311_vm3, %v1312_v37  ;;  %v1454_v59 = vshrl.u32 %v86_v0, 7  ;;  %s702_s21 = sshll.u32 %s1314_s2, 4  ;;  %s703_s21 = int_to_ptr.vmem [resolvable:$true] %s702_s21 }
  0x35   :  { %1043 = vmatpush3.bf16.msra.mxu0 %v1372_v4  ;;  %v1396_v21 = vpack.c.bf16 %v61_v16, %v60_v15  ;;  %v63_v23 = vld [vmem:[#allocation7 + $0x50] sm:$0xff]  ;;  %v1399_v24 = vld [vmem:[#allocation6] sm:$0xff]  ;;  %v65_v29 = vld [vmem:[#allocation7 + $0x60] sm:$0xff]  ;;  %s1275_s22 = scalar_lea.vmem %s703_s21, 128  ;;  %p1280_p6 = scmp.lt.s32.totalorder %s703_s21, %s703_s21 }
  0x36   :  { %1044 = vmatprep.subr.bf16.mxu0 %v1310_v3  ;;  %vm100_vm0 = vcmp.eq.s32.totalorder %v1378_v7, 0  ;;  %vm103_vm1 = vcmp.eq.s32.totalorder %v1378_v7, 4  ;;  %v1403_v26 = vpack.c.bf16 %v63_v23, %v62_v22  ;;  %v64_v28 = vld [vmem:[#allocation7 + $0x58] sm:$0xff]  ;;  %v66_v31 = vld [vmem:[#allocation7 + $0x68] sm:$0xff]  ;;  %v67_v32 = vld [vmem:[#allocation7 + $0x70] sm:$0xff]  ;;  %v109_v60 = vsub.s32 0, %v1454_v59  ;;  %p1276_p5 = scmp.ne.s32.totalorder %s703_s21, %s1275_s22  ;;  %p1281_p7 = scmp.lt.s32.totalorder %s1275_s22, %s1275_s22 }
  0x37   :  { %v1408_v30 = vpack.c.bf16 %v65_v29, %v64_v28  ;;  %v1413_v33 = vpack.c.bf16 %v67_v32, %v66_v31  ;;  %v68_v34 = vld [vmem:[#allocation7 + $0x78] sm:$0xff]  ;;  %v69_v35 = vld [vmem:[#allocation7 + $0x80] sm:$0xff]  ;;  %v70_v38 = vld [vmem:[#allocation7 + $0x88] sm:$0xff]  ;;  %v114_v62 = vsub.s32 1, %v1454_v59  ;;  %v120_v2 = vsub.s32 2, %v1454_v59 }
  0x38   :  { %v90_v11 = vstv %s713_s19  ;;  %v101_v14 = vstv %s1374_s20  ;;  %v1417_v36 = vpack.c.bf16 %v69_v35, %v68_v34  ;;  %v71_v39 = vld [vmem:[#allocation7 + $0x90] sm:$0xff]  ;;  %v72_v40 = vld [vmem:[#allocation7 + $0x98] sm:$0xff]  ;;  %v73_v42 = vld [vmem:[#allocation7 + $0xa0] sm:$0xff]  ;;  %v275_v28 = vsub.s32 5, %v1454_v59  ;;  %p1282_p8 = por %p1281_p7, %p1280_p6 }
  0x39   :  { %v91_v12 = vmul.f32 1.27, %v90_v11  ;;  %1046 = vmatpush3.bf16.msra.mxu0 %v1381_v8  ;;  %v102_v17 = vsel %vm100_vm0, %v101_v14, 0.0  ;;  %v1425_v41 = vpack.c.bf16 %v71_v39, %v70_v38  ;;  %v1428_v43 = vpack.c.bf16 %v73_v42, %v72_v40  ;;  %v74_v44 = vld [vmem:[#allocation7 + $0xa8] sm:$0xff]  ;;  %v75_v45 = vld [vmem:[#allocation7 + $0xb0] sm:$0xff]  ;;  %v76_v47 = vld [vmem:[#allocation7 + $0xb8] sm:$0xff] }
  0x3a   :  { %1047 = vmatprep.subr.bf16.mxu0 %v1310_v3  ;;  %v1393_v19 = vsel %vm103_vm1, %v90_v11, %v102_v17  ;;  %v1432_v46 = vpack.c.bf16 %v75_v45, %v74_v44  ;;  %v77_v48 = vld [vmem:[#allocation7 + $0xc0] sm:$0xff]  ;;  %v78_v50 = vld [vmem:[#allocation7 + $0xc8] sm:$0xff]  ;;  %v79_v51 = vld [vmem:[#allocation7 + $0xd0] sm:$0xff]  ;;  %v126_v17 = vsub.s32 3, %v1454_v59  ;;  %v1313_v39 = vmov 0   ;;  %p1283_p9 = pnand %p1282_p8, %p1276_p5 }
  0x3b   :  { %v714_v18 = vmax.f32 %v91_v12, 0.0  ;;  %1067 = vmatpush3.bf16.msra.mxu1 %v1425_v41  ;;  %v1436_v49 = vpack.c.bf16 %v77_v48, %v76_v47  ;;  %v1440_v52 = vpack.c.bf16 %v79_v51, %v78_v50  ;;  %v80_v53 = vld [vmem:[#allocation7 + $0xd8] sm:$0xff]  ;;  %v81_v54 = vld [vmem:[#allocation7 + $0xe0] sm:$0xff]  ;;  %v82_v56 = vld [vmem:[#allocation7 + $0xe8] sm:$0xff]  ;;  %1208 = vset.pattern.permute.xlu0 %v1313_v39  ;;  %v282_v40 = vsub.s32 6, %v1454_v59 }
  0x3c   :  { %1068 = vmatprep.subr.bf16.mxu1 %v1310_v3  ;;  %v1444_v55 = vpack.c.bf16 %v81_v54, %v80_v53  ;;  %v83_v57 = vld [vmem:[#allocation7 + $0xf0] sm:$0xff]  ;;  %v1457_v61 = vld [vmem:[#allocation7] sm:$0xff]  ;;  %1207 = vset.pattern.permute.xlu1 %v1313_v39  ;;  %vm105_vm7 = vcmp.eq.s32.totalorder %v1378_v7, 8  ;;  %vm305_vm8 = vcmp.eq.s32.totalorder %v1378_v7, 1  ;;  %vm312_vm9 = vcmp.eq.s32.totalorder %v1378_v7, 5 }
  0x3d   :  { %v715_v20 = vmin.f32 %v714_v18, 127.0  ;;  %1049 = vmatpush3.bf16.msra.mxu0 %v1387_v13  ;;  %v1448_v58 = vpack.c.bf16 %v83_v57, %v82_v56  ;;  %v1461_v63 = vrot.slane %v1457_v61, %v109_v60  ;;  %v1464_v1 = vrot.slane %v1457_v61, %v114_v62  ;;  %v85_v15 = vld [vmem:[#allocation7 + $0x100] sm:$0xff] }
  0x3e   :  { %1050 = vmatprep.subr.bf16.mxu0 %v1310_v3  ;;  %v1475_v9 = vrot.slane %v1457_v61, %v120_v2  ;;  %v1502_v18 = vrot.slane %v1457_v61, %v126_v17  ;;  %v1533_v34 = vrot.slane %v1457_v61, %v275_v28  ;;  %v1538_v42 = vrot.slane %v1457_v61, %v282_v40 }
  0x3f   :  { %v1187_v25 = vcvt.f32.s32 %v715_v20  ;;  %1070 = vmatpush3.bf16.msra.mxu1 %v1428_v43  ;;  %v111_v5 = vmul.f32 %v1461_v63, %v101_v14  ;;  %v84_v14 = vld [vmem:[#allocation7 + $0xf8] sm:$0xff]  ;;  %vm319_vm10 = vcmp.eq.s32.totalorder %v1378_v7, 9  ;;  %vm492_vm11 = vcmp.eq.s32.totalorder %v1378_v7, 2 }
  0x40   :  { %1071 = vmatprep.subr.bf16.mxu1 %v1310_v3  ;;  %v1496_v16 = vpack.c.bf16 %v85_v15, %v84_v14  ;;  %vm499_vm12 = vcmp.eq.s32.totalorder %v1378_v7, 6  ;;  %vm506_vm13 = vcmp.eq.s32.totalorder %v1378_v7, 10  ;;  %vm679_vm14 = vcmp.eq.s32.totalorder %v1378_v7, 3 }
  0x41   :  { %vm96_vm2 = vcmp.eq.s32.totalorder %v1378_v7, %v1187_v25  ;;  %1052 = vmatpush3.bf16.msra.mxu0 %v1396_v21  ;;  %v200_v25 = vsub.s32 4, %v1454_v59  ;;  %vm686_vm15 = vcmp.eq.s32.totalorder %v1378_v7, 7  ;;  %vm693_vm0 = vcmp.eq.s32.totalorder %v1378_v7, 11 }
  0x42   :  { %v97_v27 = vsel %vm96_vm2, %v1399_v24, 0.0  ;;  %1053 = vmatprep.subr.bf16.mxu0 %v1310_v3 }
  0x43   :  { %98 = vadd.xlane.f32.xlu0 %v97_v27  ;;  %1073 = vmatpush3.bf16.msra.mxu1 %v1432_v46  ;;  %v1528_v27 = vrot.slane %v1457_v61, %v200_v25 }
  0x44   :  { %1074 = vmatprep.subr.bf16.mxu1 %v1310_v3 }
  0x45   :  { %1055 = vmatpush3.bf16.msra.mxu0 %v1403_v26 }
  0x46   :  { %1056 = vmatprep.subr.bf16.mxu0 %v1310_v3 }
  0x47   :  { %1076 = vmatpush3.bf16.msra.mxu1 %v1436_v49 }
  0x48   :  { %1077 = vmatprep.subr.bf16.mxu1 %v1310_v3 }
  0x49   :  { %1058 = vmatpush3.bf16.msra.mxu0 %v1408_v30 }
  0x4a   :  { %1059 = vmatprep.subr.bf16.mxu0 %v1310_v3 }
  0x4b   :  { %1079 = vmatpush3.bf16.msra.mxu1 %v1440_v52 }
  0x4c   :  { %1080 = vmatprep.subr.bf16.mxu1 %v1310_v3 }
  0x4d   :  { %1061 = vmatpush3.bf16.msra.mxu0 %v1413_v33 }
  0x4e   :  { %1062 = vmatprep.subr.bf16.mxu0 %v1310_v3 }
  0x4f   :  { %1082 = vmatpush3.bf16.msra.mxu1 %v1444_v55 }
  0x50   :  { %1083 = vmatprep.subr.bf16.mxu1 %v1310_v3 }
  0x51   :  { %1064 = vmatpush3.bf16.msra.mxu0 %v1417_v36 }
  0x52   :  { %1089 = vmatprep.subr.bf16.mxu0 %v1310_v3 }
  0x53   :  { %1085 = vmatpush3.bf16.msra.mxu1 %v1448_v58 }
  0x54   :  { %1086 = vmatprep.subr.bf16.mxu1 %v1310_v3 }
  0x57   :  { %1088 = vmatpush3.bf16.msra.mxu1 %v1496_v16 }
  0x58   :  { %1113 = vmatprep.subr.bf16.mxu1 %v1310_v3 }
  0xd0   :  { %v1470_v6 = vpop.xlane.xlu0 %98 }
  0xd1   :  { %v116_v0 = vmul.f32 %v1464_v1, %v1470_v6 }
  0xd3   :  { %v117_v10 = vadd.f32 %v116_v0, %v111_v5 }
  0xd5   :  { %v122_v11 = vadd.f32 %v1475_v9, %v117_v10 }
  0xd7   :  { %v123_v12 = vmax.f32 %v122_v11, 0.0 }
  0xd9   :  { %864 = vmatmul.mubr.f32.vlgmr.msra.gmra.mrb[0].mxu0 %v123_v12 }
  0xda   :  { %1091 = vmatpush3.bf16.msra.mxu0 %v1372_v4  ;;  %933 = vmatprep.mubr.msk.f32.mxu0 %vm1311_vm3, %v1312_v37 }
  0xdb   :  { %1092 = vmatprep.subr.bf16.mxu0 %v1310_v3 }
  0xde   :  { %1094 = vmatpush3.bf16.msra.mxu0 %v1381_v8 }
  0xdf   :  { %1095 = vmatprep.subr.bf16.mxu0 %v1310_v3 }
  0xe2   :  { %1097 = vmatpush3.bf16.msra.mxu0 %v1387_v13 }
  0xe3   :  { %1098 = vmatprep.subr.bf16.mxu0 %v1310_v3 }
  0xe6   :  { %1100 = vmatpush3.bf16.msra.mxu0 %v1396_v21 }
  0xe7   :  { %1101 = vmatprep.subr.bf16.mxu0 %v1310_v3 }
  0xea   :  { %1103 = vmatpush3.bf16.msra.mxu0 %v1403_v26 }
  0xeb   :  { %1104 = vmatprep.subr.bf16.mxu0 %v1310_v3 }
  0xee   :  { %1106 = vmatpush3.bf16.msra.mxu0 %v1408_v30 }
  0xef   :  { %1107 = vmatprep.subr.bf16.mxu0 %v1310_v3 }
  0xf2   :  { %1109 = vmatpush3.bf16.msra.mxu0 %v1413_v33 }
  0xf3   :  { %1110 = vmatprep.subr.bf16.mxu0 %v1310_v3 }
  0xf6   :  { %1112 = vmatpush3.bf16.msra.mxu0 %v1417_v36 }
  0xf7   :  { %1137 = vmatprep.subr.bf16.mxu0 %v1310_v3 }
 0x1ac   :  { %v194_v20 = vpop.f32.mrb[0].mxu0 }
 0x1ad   :  { %v1505_v22 = vadd.f32 %v194_v20, %v1502_v18  ;;  %v865_v23 = vpop.f32.mrb[1].mxu0 }
 0x1af   :  { %899 = vmatmul.mubr.f32.vlgmr.msra.gmra.mrb[0].mxu1 %v1505_v22 }
 0x1b0   :  { %1115 = vmatpush3.bf16.msra.mxu1 %v1425_v41  ;;  %968 = vmatprep.mubr.msk.f32.mxu1 %vm1311_vm3, %v1312_v37 }
 0x1b1   :  { %1116 = vmatprep.subr.bf16.mxu1 %v1310_v3 }
 0x1b4   :  { %1118 = vmatpush3.bf16.msra.mxu1 %v1428_v43 }
 0x1b5   :  { %1119 = vmatprep.subr.bf16.mxu1 %v1310_v3 }
 0x1b8   :  { %1121 = vmatpush3.bf16.msra.mxu1 %v1432_v46 }
 0x1b9   :  { %1122 = vmatprep.subr.bf16.mxu1 %v1310_v3 }
 0x1bc   :  { %1124 = vmatpush3.bf16.msra.mxu1 %v1436_v49 }
 0x1bd   :  { %1125 = vmatprep.subr.bf16.mxu1 %v1310_v3 }
 0x1c0   :  { %1127 = vmatpush3.bf16.msra.mxu1 %v1440_v52 }
 0x1c1   :  { %1128 = vmatprep.subr.bf16.mxu1 %v1310_v3 }
 0x1c4   :  { %1130 = vmatpush3.bf16.msra.mxu1 %v1444_v55 }
 0x1c5   :  { %1131 = vmatprep.subr.bf16.mxu1 %v1310_v3 }
 0x1c8   :  { %1133 = vmatpush3.bf16.msra.mxu1 %v1448_v58 }
 0x1c9   :  { %1134 = vmatprep.subr.bf16.mxu1 %v1310_v3 }
 0x1cc   :  { %1136 = vmatpush3.bf16.msra.mxu1 %v1496_v16 }
 0x1cd   :  { %1161 = vmatprep.subr.bf16.mxu1 %v1310_v3 }
 0x282   :  { %v268_v29 = vpop.f32.mrb[0].mxu1 }
 0x283   :  { %v269_v31 = vadd.f32 %v268_v29, %v1528_v27  ;;  %v900_v32 = vpop.f32.mrb[1].mxu1 }
 0x285   :  { %v272_v35 = vmax.f32 %v269_v31, 0.0 }
 0x287   :  { %v277_v38 = vmul.f32 %v1533_v34, %v272_v35 }
 0x289   :  { %278 = vadd.xlane.f32.xlu0 %v277_v38 }
 0x316   :  { %v279_v44 = vpop.xlane.xlu0 %278 }
 0x317   :  { %v284_v45 = vadd.f32 %v1538_v42, %v279_v44 }
 0x319   :  { %v717_v47 = vmul.f32 -1.442695, %v284_v45  ;;  %308 = vperm.xlu0 %1208, %v284_v45  }
 0x31b   :  { %1209 = vpow2.f32 %v717_v47 }
 0x325   :  { %v1210_v48 = vpop.eup %1209 }
 0x326   :  { %v288_v50 = vadd.f32 1.0, %v1210_v48 }
 0x328   :  { %1211 = vrcp.f32 %v288_v50 }
 0x332   :  { %v1212_v51 = vpop.eup %1211 }
 0x333   :  { %v291_v53 = vmul.f32 99.98, %v1212_v51 }
 0x335   :  { %v1541_v54 = vadd.f32 0.01, %v291_v53 }
 0x337   :  { %v293_v56 = vmul.f32 1.27, %v1541_v54 }
 0x339   :  { %v718_v57 = vmax.f32 %v293_v56, 0.0 }
 0x33b   :  { %v719_v59 = vmin.f32 %v718_v57, 127.0 }
 0x33d   :  { %v1190_v60 = vcvt.f32.s32 %v719_v59 }
 0x33f   :  { %299 = vperm.xlu1 %1207, %v1190_v60  }
 0x398   :  { %v1546_v2 = vpop.permute.xlu0 %308 }
 0x399   :  { %v321_v0 = vmul.f32 %v1546_v2, %v1461_v63 }
 0x3be   :  { %v300_v61 = vpop.permute.xlu1 %299 }
 0x3bf   :  { %vm301_vm4 = vcmp.eq.s32.totalorder %v1378_v7, %v300_v61 }
 0x3c0   :  { %v302_v62 = vsel %vm301_vm4, %v1399_v24, 0.0 }
 0x3c1   :  { %303 = vadd.xlane.f32.xlu1 %v302_v62 }
 0x44e   :  { %v1548_v5 = vpop.xlane.xlu1 %303 }
 0x44f   :  { %v322_v10 = vmul.f32 %v1548_v5, %v1464_v1 }
 0x451   :  { %v323_v11 = vadd.f32 %v322_v10, %v321_v0  ;;  %v106_v10 = vsel %vm105_vm7, %v1470_v6, %v1393_v19 }
 0x453   :  { %v324_v12 = vadd.f32 %v323_v11, %v1475_v9  ;;  %v311_v11 = vsel %vm305_vm8, %v1546_v2, %v106_v10 }
 0x455   :  { %v325_v14 = vmax.f32 %v324_v12, 0.0 }
 0x457   :  { %934 = vmatmul.mubr.f32.vlgmr.msra.gmra.mrb[2].mxu0 %v325_v14 }
 0x458   :  { %1139 = vmatpush3.bf16.msra.mxu0 %v1372_v4  ;;  %1003 = vmatprep.mubr.msk.f32.mxu0 %vm1311_vm3, %v1312_v37 }
 0x459   :  { %1140 = vmatprep.subr.bf16.mxu0 %v1310_v3 }
 0x45c   :  { %1142 = vmatpush3.bf16.msra.mxu0 %v1381_v8 }
 0x45d   :  { %1143 = vmatprep.subr.bf16.mxu0 %v1310_v3 }
 0x460   :  { %1145 = vmatpush3.bf16.msra.mxu0 %v1387_v13 }
 0x461   :  { %1146 = vmatprep.subr.bf16.mxu0 %v1310_v3 }
 0x464   :  { %1148 = vmatpush3.bf16.msra.mxu0 %v1396_v21 }
 0x465   :  { %1149 = vmatprep.subr.bf16.mxu0 %v1310_v3 }
 0x468   :  { %1151 = vmatpush3.bf16.msra.mxu0 %v1403_v26 }
 0x469   :  { %1152 = vmatprep.subr.bf16.mxu0 %v1310_v3 }
 0x46c   :  { %1154 = vmatpush3.bf16.msra.mxu0 %v1408_v30 }
 0x46d   :  { %1155 = vmatprep.subr.bf16.mxu0 %v1310_v3 }
 0x470   :  { %1157 = vmatpush3.bf16.msra.mxu0 %v1413_v33 }
 0x471   :  { %1158 = vmatprep.subr.bf16.mxu0 %v1310_v3 }
 0x474   :  { %1160 = vmatpush3.bf16.msra.mxu0 %v1417_v36 }
 0x52a   :  { %v392_v4 = vpop.f32.mrb[2].mxu0 }
 0x52b   :  { %v393_v8 = vadd.f32 %v392_v4, %v1502_v18  ;;  %v935_v13 = vpop.f32.mrb[3].mxu0 }
 0x52d   :  { %v396_v21 = vadd.f32 %v393_v8, %v1505_v22 }
 0x52f   :  { %969 = vmatmul.mubr.f32.vlgmr.msra.gmra.mrb[2].mxu1 %v396_v21 }
 0x530   :  { %1163 = vmatpush3.bf16.msra.mxu1 %v1425_v41  ;;  %1038 = vmatprep.mubr.msk.f32.mxu1 %vm1311_vm3, %v1312_v37 }
 0x531   :  { %1164 = vmatprep.subr.bf16.mxu1 %v1310_v3 }
 0x534   :  { %1166 = vmatpush3.bf16.msra.mxu1 %v1428_v43 }
 0x535   :  { %1167 = vmatprep.subr.bf16.mxu1 %v1310_v3 }
 0x538   :  { %1169 = vmatpush3.bf16.msra.mxu1 %v1432_v46 }
 0x539   :  { %1170 = vmatprep.subr.bf16.mxu1 %v1310_v3 }
 0x53c   :  { %1172 = vmatpush3.bf16.msra.mxu1 %v1436_v49 }
 0x53d   :  { %1173 = vmatprep.subr.bf16.mxu1 %v1310_v3 }
 0x540   :  { %1175 = vmatpush3.bf16.msra.mxu1 %v1440_v52 }
 0x541   :  { %1176 = vmatprep.subr.bf16.mxu1 %v1310_v3 }
 0x544   :  { %1178 = vmatpush3.bf16.msra.mxu1 %v1444_v55 }
 0x545   :  { %1179 = vmatprep.subr.bf16.mxu1 %v1310_v3 }
 0x548   :  { %1181 = vmatpush3.bf16.msra.mxu1 %v1448_v58 }
 0x549   :  { %1182 = vmatprep.subr.bf16.mxu1 %v1310_v3 }
 0x54c   :  { %1184 = vmatpush3.bf16.msra.mxu1 %v1496_v16 }
 0x602   :  { %v463_v26 = vpop.f32.mrb[2].mxu1 }
 0x603   :  { %v464_v30 = vadd.f32 %v463_v26, %v1528_v27  ;;  %v970_v33 = vpop.f32.mrb[3].mxu1 }
 0x605   :  { %v467_v36 = vmax.f32 %v464_v30, 0.0 }
 0x607   :  { %v468_v37 = vmul.f32 %v467_v36, %v1533_v34 }
 0x609   :  { %469 = vadd.xlane.f32.xlu1 %v468_v37 }
 0x696   :  { %v470_v41 = vpop.xlane.xlu1 %469 }
 0x697   :  { %v471_v43 = vadd.f32 %v470_v41, %v1538_v42 }
 0x699   :  { %v721_v46 = vmul.f32 -1.442695, %v471_v43 }
 0x69b   :  { %1213 = vpow2.f32 %v721_v46 }
 0x6a5   :  { %v1214_v49 = vpop.eup %1213 }
 0x6a6   :  { %v475_v52 = vadd.f32 1.0, %v1214_v49 }
 0x6a8   :  { %1215 = vrcp.f32 %v475_v52 }
 0x6b2   :  { %v1216_v55 = vpop.eup %1215 }
 0x6b3   :  { %v478_v3 = vmul.f32 99.98, %v1216_v55 }
 0x6b5   :  { %v479_v58 = vadd.f32 0.01, %v478_v3 }
 0x6b7   :  { %v480_v15 = vmul.f32 1.27, %v479_v58 }
 0x6b9   :  { %v722_v16 = vmax.f32 %v480_v15, 0.0 }
 0x6bb   :  { %v723_v17 = vmin.f32 %v722_v16, 127.0 }
 0x6bd   :  { %v1193_v20 = vcvt.f32.s32 %v723_v17 }
 0x6bf   :  { %486 = vperm.xlu1 %1207, %v1193_v20  }
 0x6c3   :  { %495 = vperm.xlu1 %1207, %v471_v43  }
 0x73e   :  { %v487_v22 = vpop.permute.xlu1 %486 }
 0x73f   :  { %vm488_vm5 = vcmp.eq.s32.totalorder %v1378_v7, %v487_v22 }
 0x740   :  { %v489_v23 = vsel %vm488_vm5, %v1399_v24, 0.0 }
 0x741   :  { %490 = vadd.xlane.f32.xlu0 %v489_v23 }
 0x742   :  { %v496_v25 = vpop.permute.xlu1 %495 }
 0x743   :  { %v508_v29 = vmul.f32 %v496_v25, %v1461_v63 }
 0x7ce   :  { %v1596_v28 = vpop.xlane.xlu0 %490 }
 0x7cf   :  { %v509_v31 = vmul.f32 %v1596_v28, %v1464_v1 }
 0x7d1   :  { %v510_v32 = vadd.f32 %v509_v31, %v508_v29 }
 0x7d3   :  { %v511_v35 = vadd.f32 %v510_v32, %v1475_v9 }
 0x7d5   :  { %v512_v38 = vmax.f32 %v511_v35, 0.0 }
 0x7d7   :  { %1004 = vmatmul.mubr.f32.vlgmr.msra.gmra.mrb[4].mxu0 %v512_v38 }
 0x8aa   :  { %v579_v39 = vpop.f32.mrb[4].mxu0 }
 0x8ab   :  { %v580_v40 = vadd.f32 %v579_v39, %v1502_v18  ;;  %v1005_v44 = vpop.f32.mrb[5].mxu0 }
 0x8ad   :  { %v583_v45 = vadd.f32 %v580_v40, %v396_v21 }
 0x8af   :  { %1039 = vmatmul.mubr.f32.vlgmr.msra.gmra.mrb[4].mxu1 %v583_v45 }
 0x982   :  { %v650_v47 = vpop.f32.mrb[4].mxu1 }
 0x983   :  { %v651_v48 = vadd.f32 %v650_v47, %v1528_v27  ;;  %v1040_v50 = vpop.f32.mrb[5].mxu1 }
 0x985   :  { %v654_v51 = vmax.f32 %v651_v48, 0.0 }
 0x987   :  { %v655_v63 = vmul.f32 %v654_v51, %v1533_v34 }
 0x989   :  { %656 = vadd.xlane.f32.xlu1 %v655_v63 }
 0x99a   :  { %315 = vperm.xlu1 %1207, %v1541_v54  }
 0x99e   :  { %502 = vperm.xlu1 %1207, %v479_v58  }
 0xa16   :  { %v657_v1 = vpop.xlane.xlu1 %656 }
 0xa17   :  { %v658_v9 = vadd.f32 %v657_v1, %v1538_v42 }
 0xa19   :  { %v725_v53 = vmul.f32 -1.442695, %v658_v9  ;;  %682 = vperm.xlu1 %1207, %v658_v9  }
 0xa1a   :  { %v316_v0 = vpop.permute.xlu1 %315 }
 0xa1b   :  { %1217 = vpow2.f32 %v725_v53  ;;  %v318_v12 = vsel %vm312_vm9, %v316_v0, %v311_v11 }
 0xa1c   :  { %v320_v14 = vsel %vm319_vm10, %v1548_v5, %v318_v12 }
 0xa1d   :  { %v498_v4 = vsel %vm492_vm11, %v496_v25, %v320_v14 }
 0xa25   :  { %v1218_v18 = vpop.eup %1217 }
 0xa26   :  { %v662_v56 = vadd.f32 1.0, %v1218_v18 }
 0xa28   :  { %1219 = vrcp.f32 %v662_v56 }
 0xa32   :  { %v1220_v57 = vpop.eup %1219 }
 0xa33   :  { %v665_v59 = vmul.f32 99.98, %v1220_v57 }
 0xa35   :  { %v666_v27 = vadd.f32 0.01, %v665_v59 }
 0xa37   :  { %689 = vperm.xlu1 %1207, %v666_v27   ;;  %v667_v60 = vmul.f32 1.27, %v666_v27 }
 0xa39   :  { %v726_v61 = vmax.f32 %v667_v60, 0.0 }
 0xa3b   :  { %v727_v34 = vmin.f32 %v726_v61, 127.0 }
 0xa3d   :  { %v1196_v62 = vcvt.f32.s32 %v727_v34 }
 0xa3f   :  { %673 = vperm.xlu0 %1208, %v1196_v62  }
 0xabe   :  { %v674_v54 = vpop.permute.xlu0 %673 }
 0xabf   :  { %vm675_vm6 = vcmp.eq.s32.totalorder %v1378_v7, %v674_v54 }
 0xac0   :  { %v676_v42 = vsel %vm675_vm6, %v1399_v24, 0.0  ;;  %v503_v24 = vpop.permute.xlu1 %502 }
 0xac1   :  { %677 = vadd.xlane.f32.xlu0 %v676_v42  ;;  %v505_v13 = vsel %vm499_vm12, %v503_v24, %v498_v4 }
 0xac2   :  { %v507_v6 = vsel %vm506_vm13, %v1596_v28, %v505_v13 }
 0xac4   :  { %v683_v8 = vpop.permute.xlu1 %682 }
 0xac5   :  { %v685_v2 = vsel %vm679_vm14, %v683_v8, %v507_v6 }
 0xac8   :  { %v690_v19 = vpop.permute.xlu1 %689 }
 0xac9   :  { %v692_v5 = vsel %vm686_vm15, %v690_v19, %v685_v2 }
 0xb4e   :  { %v678_v21 = vpop.xlane.xlu0 %677 }
 0xb4f   :  { %v694_v26 = vsel %vm693_vm0, %v678_v21, %v692_v5 }
 0xb50   :  { %695 = vst [vmem:[#allocation9] sm:$0xff] %v694_v26 }
 0xb51   :  { %1286 = shalt.err (!%p1283_p9)
}
 0xb52   :  { %s1287_s25 = scalar_lea.hbm %s1639_s3, 128 }
 0xb53   :  { %p1288_p10 = scmp.ne.s32.totalorder %s1639_s3, %s1287_s25  ;;  %p1291_p11 = scmp.lt.u32.totalorder %s1287_s25, %s1639_s3 }
 0xb55   :  { %p1293_p12 = pnand %p1291_p11, %p1288_p10 }
 0xb57   :  { %1296 = shalt.err (!%p1293_p12)
}
 0xb58   :  { %705 = dma.vmem_to_hbm [thread:$0]  %s703_s21, 128, %s1639_s3, [#allocation4]  }
 0xb59   :  { %1303 = dma.done.wait [#allocation4], 128  }
 0xb5a   :  { %1304 = vsyncadd [#allocation4], 4294967168 }
 0xb5b   :  { %709 = vsyncpa [#allocation3], 1 }
 0xb5c   :  { %710 = vsyncpa [#allocation8], 1 }
 0xb5d   :  { %711 = vsyncpa [#allocation4], 1 }
 0xb5e   :  { %712 = vsyncpa [#allocation5], 1 }

</bundles_post_ra>
